<compile_context>
chip_gen: v6e
topology: v6e:2x2x1
jax: 0.10.0
libtpu: 0.0.40
codegen_flags: <defaults>
</compile_context>

<pallas_src>
import functools

import jax
import jax.numpy as jnp
from jax.experimental import pallas as pl
from jax.experimental.pallas import tpu as pltpu

MIN_LOGVAR = -5.0
MAX_LOGVAR = -1.0


def _swish(x):
    return x * jax.nn.sigmoid(x)


def _ensemble_mlp_kernel(s_ref, a_ref,
                         w1s_ref, w1a_ref, b1_ref,
                         w2_ref, b2_ref,
                         w3_ref, b3_ref,
                         w4_ref, b4_ref,
                         out_ref,
                         *, out_size):
    # All refs hold the full (E, ...) arrays — everything resident in VMEM,
    # single grid step, batched matmuls over the ensemble axis.
    s = s_ref[...]                                    # (E, B, state_dim)
    a = a_ref[...]                                    # (E, B, action_dim)

    # Layer 1 with split weights (replaces the states/actions concat).
    h = (jnp.einsum("ebi,eio->ebo", s, w1s_ref[...],
                    preferred_element_type=jnp.float32)
         + jnp.einsum("ebi,eio->ebo", a, w1a_ref[...],
                      preferred_element_type=jnp.float32)
         + b1_ref[...])
    h = _swish(h)

    h = _swish(jnp.einsum("ebi,eio->ebo", h, w2_ref[...],
                          preferred_element_type=jnp.float32) + b2_ref[...])
    h = _swish(jnp.einsum("ebi,eio->ebo", h, w3_ref[...],
                          preferred_element_type=jnp.float32) + b3_ref[...])

    op = jnp.einsum("ebi,eio->ebo", h, w4_ref[...],
                    preferred_element_type=jnp.float32) + b4_ref[...]
    # op: (E, B, 2*out_size). First half = mean (identity), second half =
    # var = exp(min + (max-min)*sigmoid(logvar)).  Compute the var transform
    # full-width and select by lane index — fully lane-aligned, no slicing.
    var_all = jnp.exp(MIN_LOGVAR
                      + (MAX_LOGVAR - MIN_LOGVAR) * jax.nn.sigmoid(op))
    lane = jax.lax.broadcasted_iota(jnp.int32, op.shape, dimension=2)
    out_ref[...] = jnp.where(lane < out_size, op, var_all)


def ensemble_model_forward(states, actions, params):
    """Forward pass of EnsembleModel (normalizer=None).

    states:  (E, B, state_dim)  float32
    actions: (E, B, action_dim) float32
    returns: (delta_mean, delta_var), each (E, B, out_size) float32
    """
    states = states.astype(jnp.float32)
    actions = actions.astype(jnp.float32)
    E, B, state_dim = states.shape
    action_dim = actions.shape[-1]

    w1, b1, w2, b2, w3, b3, w4, b4 = params
    hidden = w1.shape[-1]
    out2 = w4.shape[-1]
    out_size = out2 // 2

    # Split the first-layer weight once (tiny) so the kernel consumes states
    # and actions directly instead of a concatenated input.
    w1_s = w1[:, :state_dim, :]
    w1_a = w1[:, state_dim:, :]

    def full_spec(shape):
        # Block == full array (single grid step), so no (8,128) constraints.
        return pl.BlockSpec(shape, lambda i: (0,) * len(shape))

    kernel = functools.partial(_ensemble_mlp_kernel, out_size=out_size)

    combined = pl.pallas_call(
        kernel,
        out_shape=jax.ShapeDtypeStruct((E, B, out2), jnp.float32),
        grid_spec=pltpu.PrefetchScalarGridSpec(
            num_scalar_prefetch=0,
            grid=(1,),
            in_specs=[
                full_spec((E, B, state_dim)),     # states
                full_spec((E, B, action_dim)),    # actions
                full_spec((E, state_dim, hidden)),   # w1_s
                full_spec((E, action_dim, hidden)),  # w1_a
                full_spec((E, 1, hidden)),           # b1
                full_spec((E, hidden, hidden)),      # w2
                full_spec((E, 1, hidden)),           # b2
                full_spec((E, hidden, hidden)),      # w3
                full_spec((E, 1, hidden)),           # b3
                full_spec((E, hidden, out2)),        # w4
                full_spec((E, 1, out2)),             # b4
            ],
            out_specs=full_spec((E, B, out2)),       # [mean | var]
        ),
        compiler_params=pltpu.CompilerParams(
            dimension_semantics=("arbitrary",)),
    )(states, actions, w1_s, w1_a, b1, w2, b2, w3, b3, w4, b4)

    delta_mean = combined[..., :out_size]
    delta_var = combined[..., out_size:]
    return delta_mean, delta_var


# ---------------- deterministic parameter init (matches module shapes) -------

def _xavier_uniform(key, shape):
    fan_in, fan_out = shape
    limit = jnp.sqrt(6.0 / (fan_in + fan_out))
    return jax.random.uniform(key, shape, jnp.float32, -limit, limit)


def _xavier_normal(key, shape):
    fan_in, fan_out = shape
    std = jnp.sqrt(2.0 / (fan_in + fan_out))
    return jax.random.normal(key, shape, jnp.float32) * std


def init_ensemble_model_params(key, in_size, out_size, hidden_size,
                               ensemble_size):
    """Replicates EnsembleDenseLayer init shapes: per-ensemble (in, out) weights,
    (1, out) zero biases. SWISH layers -> xavier_uniform, LINEAR -> xavier_normal."""
    keys = jax.random.split(key, 4 * ensemble_size)
    layer_dims = [
        (in_size, hidden_size, "swish"),
        (hidden_size, hidden_size, "swish"),
        (hidden_size, hidden_size, "swish"),
        (hidden_size, out_size * 2, "linear"),
    ]
    params = []
    k_idx = 0
    for (d_in, d_out, kind) in layer_dims:
        ws = []
        for _ in range(ensemble_size):
            if kind == "swish":
                ws.append(_xavier_uniform(keys[k_idx], (d_in, d_out)))
            else:
                ws.append(_xavier_normal(keys[k_idx], (d_in, d_out)))
            k_idx += 1
        w = jnp.stack(ws, axis=0)                      # (E, d_in, d_out)
        b = jnp.zeros((ensemble_size, 1, d_out), jnp.float32)
        params.append(w)
        params.append(b)
    return tuple(params)


# ---------------- pure-JAX reference for sanity check -----------------------

def _reference_forward(states, actions, params):
    inp = jnp.concatenate([states, actions], axis=2)
    w1, b1, w2, b2, w3, b3, w4, b4 = params
    h = _swish(jnp.einsum("ebi,eio->ebo", inp, w1) + b1)
    h = _swish(jnp.einsum("ebi,eio->ebo", h, w2) + b2)
    h = _swish(jnp.einsum("ebi,eio->ebo", h, w3) + b3)
    op = jnp.einsum("ebi,eio->ebo", h, w4) + b4
    out = op.shape[-1] // 2
    mean = op[..., :out]
    logvar = jax.nn.sigmoid(op[..., out:])
    logvar = MIN_LOGVAR + (MAX_LOGVAR - MIN_LOGVAR) * logvar
    return mean, jnp.exp(logvar)


if __name__ == "__main__":
    # Small shapes consistent with the module.
    ensemble_size = 4
    batch = 8
    state_dim = 6
    action_dim = 2
    hidden_size = 32
    out_size = state_dim          # model predicts state deltas
    in_size = state_dim + action_dim

    key = jax.random.PRNGKey(0)
    k_s, k_a, k_p = jax.random.split(key, 3)
    states = jax.random.normal(k_s, (ensemble_size, batch, state_dim), jnp.float32)
    actions = jax.random.normal(k_a, (ensemble_size, batch, action_dim), jnp.float32)
    params = init_ensemble_model_params(k_p, in_size, out_size, hidden_size,
                                        ensemble_size)

    mean, var = jax.jit(ensemble_model_forward)(states, actions, params)
    jax.block_until_ready((mean, var))

    ref_mean, ref_var = _reference_forward(states, actions, params)
    assert mean.shape == (ensemble_size, batch, out_size)
    assert var.shape == (ensemble_size, batch, out_size)
    assert jnp.allclose(mean, ref_mean, atol=1e-5, rtol=1e-5)
    assert jnp.allclose(var, ref_var, atol=1e-5, rtol=1e-5)
    assert bool(jnp.all(var > 0))

    print("KERNEL_OK")
</pallas_src>

<mosaic_0001>
module attributes {stable_mosaic.version = 11 : i64} {
  func.func @_ensemble_mlp_kernel(%arg0: i32, %arg1: memref<4x8x6xf32, #tpu.memory_space<vmem>>, %arg2: memref<4x8x2xf32, #tpu.memory_space<vmem>>, %arg3: memref<4x6x32xf32, #tpu.memory_space<vmem>>, %arg4: memref<4x2x32xf32, #tpu.memory_space<vmem>>, %arg5: memref<4x1x32xf32, #tpu.memory_space<vmem>>, %arg6: memref<4x32x32xf32, #tpu.memory_space<vmem>>, %arg7: memref<4x1x32xf32, #tpu.memory_space<vmem>>, %arg8: memref<4x32x32xf32, #tpu.memory_space<vmem>>, %arg9: memref<4x1x32xf32, #tpu.memory_space<vmem>>, %arg10: memref<4x32x12xf32, #tpu.memory_space<vmem>>, %arg11: memref<4x1x12xf32, #tpu.memory_space<vmem>>, %arg12: memref<4x8x12xf32, #tpu.memory_space<vmem>>) attributes {dimension_semantics = [#tpu.dimension_semantics<arbitrary>], iteration_bounds = array<i64: 1>, scalar_prefetch = 0 : i64, scratch_operands = 0 : i64, tpu.core_type = #tpu.core_type<tc>, window_params = [{pipeline_mode = #tpu.pipeline_mode<synchronous>, transform_indices = @transform_0, window_bounds = array<i64: 4, 8, 6>}, {pipeline_mode = #tpu.pipeline_mode<synchronous>, transform_indices = @transform_1, window_bounds = array<i64: 4, 8, 2>}, {pipeline_mode = #tpu.pipeline_mode<synchronous>, transform_indices = @transform_2, window_bounds = array<i64: 4, 6, 32>}, {pipeline_mode = #tpu.pipeline_mode<synchronous>, transform_indices = @transform_3, window_bounds = array<i64: 4, 2, 32>}, {pipeline_mode = #tpu.pipeline_mode<synchronous>, transform_indices = @transform_4, window_bounds = array<i64: 4, 1, 32>}, {pipeline_mode = #tpu.pipeline_mode<synchronous>, transform_indices = @transform_5, window_bounds = array<i64: 4, 32, 32>}, {pipeline_mode = #tpu.pipeline_mode<synchronous>, transform_indices = @transform_6, window_bounds = array<i64: 4, 1, 32>}, {pipeline_mode = #tpu.pipeline_mode<synchronous>, transform_indices = @transform_7, window_bounds = array<i64: 4, 32, 32>}, {pipeline_mode = #tpu.pipeline_mode<synchronous>, transform_indices = @transform_8, window_bounds = array<i64: 4, 1, 32>}, {pipeline_mode = #tpu.pipeline_mode<synchronous>, transform_indices = @transform_9, window_bounds = array<i64: 4, 32, 12>}, {pipeline_mode = #tpu.pipeline_mode<synchronous>, transform_indices = @transform_10, window_bounds = array<i64: 4, 1, 12>}, {pipeline_mode = #tpu.pipeline_mode<synchronous>, transform_indices = @transform_11, window_bounds = array<i64: 4, 8, 12>}]} {
    %c0 = arith.constant 0 : index
    %c0_0 = arith.constant 0 : index
    %c0_1 = arith.constant 0 : index
    %0 = vector.load %arg1[%c0, %c0_0, %c0_1] : memref<4x8x6xf32, #tpu.memory_space<vmem>>, vector<4x8x6xf32>
    %c0_2 = arith.constant 0 : index
    %c0_3 = arith.constant 0 : index
    %c0_4 = arith.constant 0 : index
    %1 = vector.load %arg2[%c0_2, %c0_3, %c0_4] : memref<4x8x2xf32, #tpu.memory_space<vmem>>, vector<4x8x2xf32>
    %c0_5 = arith.constant 0 : index
    %c0_6 = arith.constant 0 : index
    %c0_7 = arith.constant 0 : index
    %2 = vector.load %arg3[%c0_5, %c0_6, %c0_7] : memref<4x6x32xf32, #tpu.memory_space<vmem>>, vector<4x6x32xf32>
    "tpu.trace_start"() <{level = 10 : i32, message = "ebi,eio->ebo"}> : () -> ()
    %cst = arith.constant dense<0.000000e+00> : vector<4x8x32xf32>
    %3 = tpu.matmul %0, %2, %cst {dimension_numbers = #tpu.dot_dimension_numbers<[2], [1], [1], [2], [0, 0, 0, 1, 1, 2], [0], [0]>} : vector<4x8x6xf32>, vector<4x6x32xf32>, vector<4x8x32xf32> -> vector<4x8x32xf32>
    "tpu.trace_stop"() : () -> ()
    %c0_8 = arith.constant 0 : index
    %c0_9 = arith.constant 0 : index
    %c0_10 = arith.constant 0 : index
    %4 = vector.load %arg4[%c0_8, %c0_9, %c0_10] : memref<4x2x32xf32, #tpu.memory_space<vmem>>, vector<4x2x32xf32>
    "tpu.trace_start"() <{level = 10 : i32, message = "ebi,eio->ebo"}> : () -> ()
    %cst_11 = arith.constant dense<0.000000e+00> : vector<4x8x32xf32>
    %5 = tpu.matmul %1, %4, %cst_11 {dimension_numbers = #tpu.dot_dimension_numbers<[2], [1], [1], [2], [0, 0, 0, 1, 1, 2], [0], [0]>} : vector<4x8x2xf32>, vector<4x2x32xf32>, vector<4x8x32xf32> -> vector<4x8x32xf32>
    "tpu.trace_stop"() : () -> ()
    %6 = arith.addf %3, %5 : vector<4x8x32xf32>
    %c0_12 = arith.constant 0 : index
    %c0_13 = arith.constant 0 : index
    %c0_14 = arith.constant 0 : index
    %7 = vector.load %arg5[%c0_12, %c0_13, %c0_14] : memref<4x1x32xf32, #tpu.memory_space<vmem>>, vector<4x1x32xf32>
    %8 = vector.broadcast %7 : vector<4x1x32xf32> to vector<4x8x32xf32>
    %9 = arith.addf %6, %8 : vector<4x8x32xf32>
    %10 = arith.negf %9 : vector<4x8x32xf32>
    %11 = math.exp %10 : vector<4x8x32xf32>
    %cst_15 = arith.constant 1.000000e+00 : f32
    %12 = vector.broadcast %cst_15 : f32 to vector<4x8x32xf32>
    %13 = arith.addf %12, %11 : vector<4x8x32xf32>
    %14 = arith.divf %12, %13 : vector<4x8x32xf32>
    %15 = arith.mulf %9, %14 : vector<4x8x32xf32>
    %c0_16 = arith.constant 0 : index
    %c0_17 = arith.constant 0 : index
    %c0_18 = arith.constant 0 : index
    %16 = vector.load %arg6[%c0_16, %c0_17, %c0_18] : memref<4x32x32xf32, #tpu.memory_space<vmem>>, vector<4x32x32xf32>
    "tpu.trace_start"() <{level = 10 : i32, message = "ebi,eio->ebo"}> : () -> ()
    %cst_19 = arith.constant dense<0.000000e+00> : vector<4x8x32xf32>
    %17 = tpu.matmul %15, %16, %cst_19 {dimension_numbers = #tpu.dot_dimension_numbers<[2], [1], [1], [2], [0, 0, 0, 1, 1, 2], [0], [0]>} : vector<4x8x32xf32>, vector<4x32x32xf32>, vector<4x8x32xf32> -> vector<4x8x32xf32>
    "tpu.trace_stop"() : () -> ()
    %c0_20 = arith.constant 0 : index
    %c0_21 = arith.constant 0 : index
    %c0_22 = arith.constant 0 : index
    %18 = vector.load %arg7[%c0_20, %c0_21, %c0_22] : memref<4x1x32xf32, #tpu.memory_space<vmem>>, vector<4x1x32xf32>
    %19 = vector.broadcast %18 : vector<4x1x32xf32> to vector<4x8x32xf32>
    %20 = arith.addf %17, %19 : vector<4x8x32xf32>
    %21 = arith.negf %20 : vector<4x8x32xf32>
    %22 = math.exp %21 : vector<4x8x32xf32>
    %cst_23 = arith.constant 1.000000e+00 : f32
    %23 = vector.broadcast %cst_23 : f32 to vector<4x8x32xf32>
    %24 = arith.addf %23, %22 : vector<4x8x32xf32>
    %25 = arith.divf %23, %24 : vector<4x8x32xf32>
    %26 = arith.mulf %20, %25 : vector<4x8x32xf32>
    %c0_24 = arith.constant 0 : index
    %c0_25 = arith.constant 0 : index
    %c0_26 = arith.constant 0 : index
    %27 = vector.load %arg8[%c0_24, %c0_25, %c0_26] : memref<4x32x32xf32, #tpu.memory_space<vmem>>, vector<4x32x32xf32>
    "tpu.trace_start"() <{level = 10 : i32, message = "ebi,eio->ebo"}> : () -> ()
    %cst_27 = arith.constant dense<0.000000e+00> : vector<4x8x32xf32>
    %28 = tpu.matmul %26, %27, %cst_27 {dimension_numbers = #tpu.dot_dimension_numbers<[2], [1], [1], [2], [0, 0, 0, 1, 1, 2], [0], [0]>} : vector<4x8x32xf32>, vector<4x32x32xf32>, vector<4x8x32xf32> -> vector<4x8x32xf32>
    "tpu.trace_stop"() : () -> ()
    %c0_28 = arith.constant 0 : index
    %c0_29 = arith.constant 0 : index
    %c0_30 = arith.constant 0 : index
    %29 = vector.load %arg9[%c0_28, %c0_29, %c0_30] : memref<4x1x32xf32, #tpu.memory_space<vmem>>, vector<4x1x32xf32>
    %30 = vector.broadcast %29 : vector<4x1x32xf32> to vector<4x8x32xf32>
    %31 = arith.addf %28, %30 : vector<4x8x32xf32>
    %32 = arith.negf %31 : vector<4x8x32xf32>
    %33 = math.exp %32 : vector<4x8x32xf32>
    %cst_31 = arith.constant 1.000000e+00 : f32
    %34 = vector.broadcast %cst_31 : f32 to vector<4x8x32xf32>
    %35 = arith.addf %34, %33 : vector<4x8x32xf32>
    %36 = arith.divf %34, %35 : vector<4x8x32xf32>
    %37 = arith.mulf %31, %36 : vector<4x8x32xf32>
    %c0_32 = arith.constant 0 : index
    %c0_33 = arith.constant 0 : index
    %c0_34 = arith.constant 0 : index
    %38 = vector.load %arg10[%c0_32, %c0_33, %c0_34] : memref<4x32x12xf32, #tpu.memory_space<vmem>>, vector<4x32x12xf32>
    "tpu.trace_start"() <{level = 10 : i32, message = "ebi,eio->ebo"}> : () -> ()
    %cst_35 = arith.constant dense<0.000000e+00> : vector<4x8x12xf32>
    %39 = tpu.matmul %37, %38, %cst_35 {dimension_numbers = #tpu.dot_dimension_numbers<[2], [1], [1], [2], [0, 0, 0, 1, 1, 2], [0], [0]>} : vector<4x8x32xf32>, vector<4x32x12xf32>, vector<4x8x12xf32> -> vector<4x8x12xf32>
    "tpu.trace_stop"() : () -> ()
    %c0_36 = arith.constant 0 : index
    %c0_37 = arith.constant 0 : index
    %c0_38 = arith.constant 0 : index
    %40 = vector.load %arg11[%c0_36, %c0_37, %c0_38] : memref<4x1x12xf32, #tpu.memory_space<vmem>>, vector<4x1x12xf32>
    %41 = vector.broadcast %40 : vector<4x1x12xf32> to vector<4x8x12xf32>
    %42 = arith.addf %39, %41 : vector<4x8x12xf32>
    %43 = arith.negf %42 : vector<4x8x12xf32>
    %44 = math.exp %43 : vector<4x8x12xf32>
    %cst_39 = arith.constant 1.000000e+00 : f32
    %45 = vector.broadcast %cst_39 : f32 to vector<4x8x12xf32>
    %46 = arith.addf %45, %44 : vector<4x8x12xf32>
    %47 = arith.divf %45, %46 : vector<4x8x12xf32>
    %cst_40 = arith.constant 4.000000e+00 : f32
    %48 = vector.broadcast %cst_40 : f32 to vector<4x8x12xf32>
    %49 = arith.mulf %48, %47 : vector<4x8x12xf32>
    %cst_41 = arith.constant -5.000000e+00 : f32
    %50 = vector.broadcast %cst_41 : f32 to vector<4x8x12xf32>
    %51 = arith.addf %50, %49 : vector<4x8x12xf32>
    %52 = math.exp %51 : vector<4x8x12xf32>
    %53 = tpu.iota {dimensions = array<i32: 2>} : vector<4x8x12xi32>
    %c6_i32 = arith.constant 6 : i32
    %54 = vector.broadcast %c6_i32 : i32 to vector<4x8x12xi32>
    %55 = arith.cmpi slt, %53, %54 : vector<4x8x12xi32>
    %56 = arith.select %55, %42, %52 : vector<4x8x12xi1>, vector<4x8x12xf32>
    %c0_42 = arith.constant 0 : index
    %c0_43 = arith.constant 0 : index
    %c0_44 = arith.constant 0 : index
    %57 = vector.load %arg12[%c0_42, %c0_43, %c0_44] : memref<4x8x12xf32, #tpu.memory_space<vmem>>, vector<4x8x12xf32>
    tpu.vector_store %arg12[%c0_42, %c0_43, %c0_44], %56 {strides = array<i32>} : memref<4x8x12xf32, #tpu.memory_space<vmem>>, vector<4x8x12xf32>,
    return
  }
  func.func @transform_0(%arg0: i32) -> (i32, i32, i32) {
    %c0_i32 = arith.constant 0 : i32
    %c0_i32_0 = arith.constant 0 : i32
    %c0_i32_1 = arith.constant 0 : i32
    %c0_i32_2 = arith.constant 0 : i32
    return %c0_i32, %c0_i32_0, %c0_i32_1 : i32, i32, i32
  }
  func.func @transform_1(%arg0: i32) -> (i32, i32, i32) {
    %c0_i32 = arith.constant 0 : i32
    %c0_i32_0 = arith.constant 0 : i32
    %c0_i32_1 = arith.constant 0 : i32
    %c0_i32_2 = arith.constant 0 : i32
    return %c0_i32, %c0_i32_0, %c0_i32_1 : i32, i32, i32
  }
  func.func @transform_2(%arg0: i32) -> (i32, i32, i32) {
    %c0_i32 = arith.constant 0 : i32
    %c0_i32_0 = arith.constant 0 : i32
    %c0_i32_1 = arith.constant 0 : i32
    %c0_i32_2 = arith.constant 0 : i32
    return %c0_i32, %c0_i32_0, %c0_i32_1 : i32, i32, i32
  }
  func.func @transform_3(%arg0: i32) -> (i32, i32, i32) {
    %c0_i32 = arith.constant 0 : i32
    %c0_i32_0 = arith.constant 0 : i32
    %c0_i32_1 = arith.constant 0 : i32
    %c0_i32_2 = arith.constant 0 : i32
    return %c0_i32, %c0_i32_0, %c0_i32_1 : i32, i32, i32
  }
  func.func @transform_4(%arg0: i32) -> (i32, i32, i32) {
    %c0_i32 = arith.constant 0 : i32
    %c0_i32_0 = arith.constant 0 : i32
    %c0_i32_1 = arith.constant 0 : i32
    %c0_i32_2 = arith.constant 0 : i32
    return %c0_i32, %c0_i32_0, %c0_i32_1 : i32, i32, i32
  }
  func.func @transform_5(%arg0: i32) -> (i32, i32, i32) {
    %c0_i32 = arith.constant 0 : i32
    %c0_i32_0 = arith.constant 0 : i32
    %c0_i32_1 = arith.constant 0 : i32
    %c0_i32_2 = arith.constant 0 : i32
    return %c0_i32, %c0_i32_0, %c0_i32_1 : i32, i32, i32
  }
  func.func @transform_6(%arg0: i32) -> (i32, i32, i32) {
    %c0_i32 = arith.constant 0 : i32
    %c0_i32_0 = arith.constant 0 : i32
    %c0_i32_1 = arith.constant 0 : i32
    %c0_i32_2 = arith.constant 0 : i32
    return %c0_i32, %c0_i32_0, %c0_i32_1 : i32, i32, i32
  }
  func.func @transform_7(%arg0: i32) -> (i32, i32, i32) {
    %c0_i32 = arith.constant 0 : i32
    %c0_i32_0 = arith.constant 0 : i32
    %c0_i32_1 = arith.constant 0 : i32
    %c0_i32_2 = arith.constant 0 : i32
    return %c0_i32, %c0_i32_0, %c0_i32_1 : i32, i32, i32
  }
  func.func @transform_8(%arg0: i32) -> (i32, i32, i32) {
    %c0_i32 = arith.constant 0 : i32
    %c0_i32_0 = arith.constant 0 : i32
    %c0_i32_1 = arith.constant 0 : i32
    %c0_i32_2 = arith.constant 0 : i32
    return %c0_i32, %c0_i32_0, %c0_i32_1 : i32, i32, i32
  }
  func.func @transform_9(%arg0: i32) -> (i32, i32, i32) {
    %c0_i32 = arith.constant 0 : i32
    %c0_i32_0 = arith.constant 0 : i32
    %c0_i32_1 = arith.constant 0 : i32
    %c0_i32_2 = arith.constant 0 : i32
    return %c0_i32, %c0_i32_0, %c0_i32_1 : i32, i32, i32
  }
  func.func @transform_10(%arg0: i32) -> (i32, i32, i32) {
    %c0_i32 = arith.constant 0 : i32
    %c0_i32_0 = arith.constant 0 : i32
    %c0_i32_1 = arith.constant 0 : i32
    %c0_i32_2 = arith.constant 0 : i32
    return %c0_i32, %c0_i32_0, %c0_i32_1 : i32, i32, i32
  }
  func.func @transform_11(%arg0: i32) -> (i32, i32, i32) {
    %c0_i32 = arith.constant 0 : i32
    %c0_i32_0 = arith.constant 0 : i32
    %c0_i32_1 = arith.constant 0 : i32
    %c0_i32_2 = arith.constant 0 : i32
    return %c0_i32, %c0_i32_0, %c0_i32_1 : i32, i32, i32
  }
}

</mosaic_0001>

<bundles_post_ra>
// kernel: ensemble_model_forward.1
= control target key start
LH: loop header
LB: loop body
LE: loop exit
PB: predicated region body
PF: predicated region fallthrough
CT: control target
= control target key end

     0   :  { %16 = vsyncpa [#allocation3], 0  ;;  %s2269_s17 = smov [#allocation2]   ;;  %s2701_s0 = inlined_call_operand.vmem [shape: f32[4,8,6], index: 0, kind: input, shape index: {}]   ;;  %s2702_s1 = inlined_call_operand.vmem [shape: f32[4,8,2], index: 1, kind: input, shape index: {}]   ;;  %s2703_s2 = inlined_call_operand.vmem [shape: f32[4,6,32], index: 2, kind: input, shape index: {}]   ;;  %s2704_s3 = inlined_call_operand.vmem [shape: f32[4,2,32], index: 3, kind: input, shape index: {}]   ;;  %s2705_s4 = inlined_call_operand.hbm [shape: f32[4,1,32], index: 4, kind: input, shape index: {}]   ;;  %s2706_s5 = inlined_call_operand.vmem [shape: f32[4,32,32], index: 5, kind: input, shape index: {}]   ;;  %s2707_s6 = inlined_call_operand.vmem [shape: f32[4,1,32], index: 6, kind: input, shape index: {}]   ;;  %s2708_s7 = inlined_call_operand.vmem [shape: f32[4,32,32], index: 7, kind: input, shape index: {}]   ;;  %s2709_s8 = inlined_call_operand.vmem [shape: f32[4,1,32], index: 8, kind: input, shape index: {}]   ;;  %s2710_s9 = inlined_call_operand.vmem [shape: f32[4,32,12], index: 9, kind: input, shape index: {}]   ;;  %s2711_s10 = inlined_call_operand.vmem [shape: f32[4,1,12], index: 10, kind: input, shape index: {}]   ;;  %s2712_s11 = inlined_call_operand.vmem [shape: f32[4,8,12], index: 11, kind: output, shape index: {}]  }
   0x1   :  { %s30_s18 = sshll.u32 %s2269_s17, 4  ;;  %s31_s18 = int_to_ptr.vmem [resolvable:$true] %s30_s18 }
   0x2   :  { %s2255_s19 = scalar_lea.vmem %s31_s18, 64  ;;  %p2260_p1 = scmp.lt.s32.totalorder %s31_s18, %s31_s18 }
   0x3   :  { %p2256_p0 = scmp.ne.s32.totalorder %s31_s18, %s2255_s19  ;;  %p2261_p2 = scmp.lt.s32.totalorder %s2255_s19, %s2255_s19 }
   0x5   :  { %p2262_p3 = por %p2261_p2, %p2260_p1 }
   0x7   :  { %p2263_p4 = pnand %p2262_p3, %p2256_p0 }
   0x9   :  { %2266 = shalt.err (!%p2263_p4)
}
   0xa   :  { %s2270_s20 = smov 16   ;;  %s2271_s21 = smov 1  }
   0xb   :  { %36 = dma.hbm_to_vmem [thread:$0]  %s2705_s4, 64, %s31_s18, [#allocation3], %s2270_s20, %s2270_s20, %s2271_s21  }
   0xc   :  { %2267 = dma.done.wait [#allocation3], 64  }
   0xd   :  { %2268 = vsyncadd [#allocation3], 4294967232  ;;  %v2272_v0 = vmov 0.0   ;;  %vm2273_vm0 = vmmov 0   ;;  %vm72_vm1 = vcmask 1041408   ;;  %vm68_vm2 = vcmask 15360  }
   0xe   :  { %1998 = vmatprep.subr.mxu0 %v2272_v0  ;;  %2003 = vmatprep.subr.mxu1 %v2272_v0  ;;  %v64_v1 = vld [vmem:[%s2704_s3] sm:$0x3]  ;;  %v65_v2 = vld [vmem:[%s2704_s3 + $0x2] sm:$0x3]  ;;  %v57_v4 = vld [vmem:[%s2702_s1 + $0x8] sm:$0xff]  ;;  %vm378_vm3 = vcmask 1045504  }
   0xf   :  { %2000 = vmatprep.mubr.msk.f32.mxu0 %vm2273_vm0, %v2272_v0  ;;  %2005 = vmatprep.mubr.msk.f32.mxu1 %vm2273_vm0, %v2272_v0  ;;  %v56_v3 = vld [vmem:[%s2702_s1] sm:$0xff]  ;;  %v58_v7 = vld [vmem:[%s2702_s1 + $0x10] sm:$0xff]  ;;  %v59_v8 = vld [vmem:[%s2702_s1 + $0x18] sm:$0xff]  ;;  %vm374_vm4 = vcmask 48128   ;;  %vm784_vm5 = vcmask 261120   ;;  %vm1852_vm7 = vcmask 97280  }
  0x10   :  { %1999 = vmatpush3.msk.msra.mxu0 %vm72_vm1, %v64_v1  ;;  %2004 = vmatpush3.msk.msra.mxu1 %vm72_vm1, %v65_v2  ;;  %v66_v5 = vld [vmem:[%s2704_s3 + $0x4] sm:$0x3]  ;;  %v67_v6 = vld [vmem:[%s2704_s3 + $0x6] sm:$0x3]  ;;  %v61_v10 = vld [vmem:[%s2703_s2 + $0x8] sm:$0x3f] }
  0x11   :  { %2001 = vmatmul.mubr.msk.f32.vlgmr.msra.gmra.mxu0 %vm68_vm2, %v56_v3  ;;  %2006 = vmatmul.mubr.msk.f32.vlgmr.msra.gmra.mxu1 %vm68_vm2, %v57_v4  ;;  %v60_v9 = vld [vmem:[%s2703_s2] sm:$0x3f]  ;;  %v53_v12 = vld [vmem:[%s2701_s0 + $0x8] sm:$0xff]  ;;  %v62_v13 = vld [vmem:[%s2703_s2 + $0x10] sm:$0x3f] }
  0x12   :  { %2008 = vmatprep.subr.mxu0 %v2272_v0  ;;  %2013 = vmatprep.subr.mxu1 %v2272_v0  ;;  %v52_v11 = vld [vmem:[%s2701_s0] sm:$0xff]  ;;  %v63_v14 = vld [vmem:[%s2703_s2 + $0x18] sm:$0x3f]  ;;  %v54_v15 = vld [vmem:[%s2701_s0 + $0x10] sm:$0xff] }
  0x13   :  { %2009 = vmatpush3.msk.msra.mxu0 %vm72_vm1, %v66_v5  ;;  %2014 = vmatpush3.msk.msra.mxu1 %vm72_vm1, %v67_v6  ;;  %v55_v16 = vld [vmem:[%s2701_s0 + $0x18] sm:$0xff]  ;;  %v742_v19 = vld [vmem:[%s2706_s5 + $0x10] sm:$0xff]  ;;  %v741_v21 = vld [vmem:[%s2706_s5 + $0x8] sm:$0xff] }
  0x14   :  { %2010 = vmatprep.mubr.msk.f32.mxu0 %vm2273_vm0, %v2272_v0  ;;  %2015 = vmatprep.mubr.msk.f32.mxu1 %vm2273_vm0, %v2272_v0  ;;  %v743_v17 = vld [vmem:[%s2706_s5 + $0x18] sm:$0xff]  ;;  %v746_v20 = vld [vmem:[%s2706_s5 + $0x30] sm:$0xff]  ;;  %v745_v22 = vld [vmem:[%s2706_s5 + $0x28] sm:$0xff] }
  0x15   :  { %2011 = vmatmul.mubr.msk.f32.vlgmr.msra.gmra.mxu0 %vm68_vm2, %v58_v7  ;;  %2016 = vmatmul.mubr.msk.f32.vlgmr.msra.gmra.mxu1 %vm68_vm2, %v59_v8  ;;  %v747_v18 = vld [vmem:[%s2706_s5 + $0x38] sm:$0xff]  ;;  %v740_v23 = vld [vmem:[%s2706_s5] sm:$0xff]  ;;  %v750_v8 = vld [vmem:[%s2706_s5 + $0x50] sm:$0xff] }
  0x16   :  { %2018 = vmatprep.subr.mxu0 %v2272_v0  ;;  %2023 = vmatprep.subr.mxu1 %v2272_v0  ;;  %v744_v24 = vld [vmem:[%s2706_s5 + $0x20] sm:$0xff]  ;;  %v751_v5 = vld [vmem:[%s2706_s5 + $0x58] sm:$0xff] }
  0x17   :  { %2019 = vmatpush3.msk.msra.mxu0 %vm378_vm3, %v60_v9  ;;  %2024 = vmatpush3.msk.msra.mxu1 %vm378_vm3, %v61_v10  ;;  %v1878_v34 = vld [vmem:[#allocation2] ss:$0 sm:$0xff]  ;;  %v1879_v36 = vld [vmem:[#allocation2 + $0x1] ss:$0 sm:$0xff]  ;;  %v1880_v44 = vld [vmem:[#allocation2 + $0x2] ss:$0 sm:$0xff] }
  0x18   :  { %2020 = vmatprep.mubr.msk.f32.mxu0 %vm2273_vm0, %v2272_v0  ;;  %2025 = vmatprep.mubr.msk.f32.mxu1 %vm2273_vm0, %v2272_v0  ;;  %v1881_v46 = vld [vmem:[#allocation2 + $0x3] ss:$0 sm:$0xff]  ;;  %v755_v7 = vld [vmem:[%s2706_s5 + $0x78] sm:$0xff]  ;;  %v754_v9 = vld [vmem:[%s2706_s5 + $0x70] sm:$0xff] }
  0x19   :  { %2021 = vmatmul.mubr.msk.f32.vlgmr.msra.gmra.mxu0 %vm374_vm4, %v52_v11  ;;  %2026 = vmatmul.mubr.msk.f32.vlgmr.msra.gmra.mxu1 %vm374_vm4, %v53_v12  ;;  %v749_v10 = vld [vmem:[%s2706_s5 + $0x48] sm:$0xff] }
  0x1a   :  { %2028 = vmatprep.subr.mxu0 %v2272_v0  ;;  %2033 = vmatprep.subr.mxu1 %v2272_v0  ;;  %v753_v11 = vld [vmem:[%s2706_s5 + $0x68] sm:$0xff] }
  0x1b   :  { %2029 = vmatpush3.msk.msra.mxu0 %vm378_vm3, %v62_v13  ;;  %2030 = vmatprep.mubr.msk.f32.mxu0 %vm2273_vm0, %v2272_v0  ;;  %v748_v13 = vld [vmem:[%s2706_s5 + $0x40] sm:$0xff] }
  0x1c   :  { %2034 = vmatpush3.msk.msra.mxu1 %vm378_vm3, %v63_v14  ;;  %2035 = vmatprep.mubr.msk.f32.mxu1 %vm2273_vm0, %v2272_v0 }
  0x1d   :  { %2031 = vmatmul.mubr.msk.f32.vlgmr.msra.gmra.mxu0 %vm374_vm4, %v54_v15  ;;  %2036 = vmatmul.mubr.msk.f32.vlgmr.msra.gmra.mxu1 %vm374_vm4, %v55_v16  ;;  %v752_v15 = vld [vmem:[%s2706_s5 + $0x60] sm:$0xff] }
  0x1e   :  { %2038 = vmatprep.subr.mxu0 %v2272_v0  ;;  %2049 = vmatprep.subr.mxu1 %v2272_v0 }
  0x1f   :  { %2046 = vmatprep.mubr.msk.f32.mxu0 %vm2273_vm0, %v2272_v0  ;;  %2057 = vmatprep.mubr.msk.f32.mxu1 %vm2273_vm0, %v2272_v0 }
  0x20   :  { %2039 = vmatpush3.msra.mxu0 %v743_v17  ;;  %2050 = vmatpush3.msra.mxu1 %v747_v18  ;;  %v1108_v18 = vld [vmem:[%s2708_s7 + $0x18] sm:$0xff] }
  0x21   :  { %2040 = vmatprep.subr.mxu0 %v2272_v0  ;;  %2051 = vmatprep.subr.mxu1 %v2272_v0 }
  0x22   :  { %2041 = vmatpush3.msra.mxu0 %v742_v19  ;;  %2052 = vmatpush3.msra.mxu1 %v746_v20  ;;  %v1112_v19 = vld [vmem:[%s2708_s7 + $0x38] sm:$0xff]  ;;  %v1107_v20 = vld [vmem:[%s2708_s7 + $0x10] sm:$0xff] }
  0x23   :  { %2042 = vmatprep.subr.mxu0 %v2272_v0  ;;  %2053 = vmatprep.subr.mxu1 %v2272_v0 }
  0x24   :  { %2043 = vmatpush3.msra.mxu0 %v741_v21  ;;  %2054 = vmatpush3.msra.mxu1 %v745_v22  ;;  %v1111_v21 = vld [vmem:[%s2708_s7 + $0x30] sm:$0xff]  ;;  %v1106_v22 = vld [vmem:[%s2708_s7 + $0x8] sm:$0xff] }
  0x25   :  { %2044 = vmatprep.subr.mxu0 %v2272_v0  ;;  %2055 = vmatprep.subr.mxu1 %v2272_v0 }
  0x26   :  { %2045 = vmatpush3.msra.mxu0 %v740_v23  ;;  %2056 = vmatpush3.msra.mxu1 %v744_v24  ;;  %v1110_v23 = vld [vmem:[%s2708_s7 + $0x28] sm:$0xff]  ;;  %v1105_v24 = vld [vmem:[%s2708_s7] sm:$0xff] }
  0x27   :  { %2060 = vmatprep.subr.mxu0 %v2272_v0  ;;  %2071 = vmatprep.subr.mxu1 %v2272_v0 }
  0xd1   :  { %v142_v25 = vpop.f32.mrf.mxu0  ;;  %v218_v26 = vpop.f32.mrf.mxu1 }
  0xd3   :  { %v2002_v27 = vpop.f32.mrf.mxu0  ;;  %v2007_v28 = vpop.f32.mrf.mxu1 }
  0xd4   :  { %v1887_v27 = vld [vmem:[%s2707_s6 + $0x1] ss:$0 sm:$0xff] }
  0xd5   :  { %v294_v29 = vpop.f32.mrf.mxu0  ;;  %v370_v30 = vpop.f32.mrf.mxu1 }
  0xd7   :  { %v2012_v31 = vpop.f32.mrf.mxu0  ;;  %v2017_v32 = vpop.f32.mrf.mxu1 }
  0xd9   :  { %v448_v33 = vpop.f32.mrf.mxu0  ;;  %v524_v35 = vpop.f32.mrf.mxu1 }
  0xda   :  { %v449_v37 = vadd.f32 %v448_v33, %v142_v25  ;;  %v525_v38 = vadd.f32 %v524_v35, %v218_v26  ;;  %v1109_v25 = vld [vmem:[%s2708_s7 + $0x20] sm:$0xff] }
  0xdb   :  { %v2022_v39 = vpop.f32.mrf.mxu0  ;;  %v2027_v40 = vpop.f32.mrf.mxu1  ;;  %v1886_v26 = vld [vmem:[%s2707_s6] ss:$0 sm:$0xff] }
  0xdc   :  { %v708_v41 = vadd.f32 %v1878_v34, %v449_v37  ;;  %v709_v42 = vadd.f32 %v1879_v36, %v525_v38  ;;  %v1888_v36 = vld [vmem:[%s2707_s6 + $0x2] ss:$0 sm:$0xff]  ;;  %v1889_v37 = vld [vmem:[%s2707_s6 + $0x3] ss:$0 sm:$0xff] }
  0xdd   :  { %v600_v43 = vpop.f32.mrf.mxu0  ;;  %v676_v45 = vpop.f32.mrf.mxu1 }
  0xde   :  { %v1882_v47 = vmul.f32 -1.442695, %v708_v41  ;;  %v1883_v48 = vmul.f32 -1.442695, %v709_v42  ;;  %v601_v49 = vadd.f32 %v600_v43, %v294_v29  ;;  %v677_v50 = vadd.f32 %v676_v45, %v370_v30 }
  0xdf   :  { %v2032_v51 = vpop.f32.mrf.mxu0  ;;  %v2037_v52 = vpop.f32.mrf.mxu1 }
  0xe0   :  { %2175 = vpow2.f32 %v1882_v47  ;;  %v710_v53 = vadd.f32 %v1880_v44, %v601_v49  ;;  %v711_v54 = vadd.f32 %v1881_v46, %v677_v50 }
  0xe1   :  { %2177 = vpow2.f32 %v1883_v48 }
  0xe2   :  { %v1884_v55 = vmul.f32 -1.442695, %v710_v53  ;;  %v1885_v56 = vmul.f32 -1.442695, %v711_v54 }
  0xe4   :  { %2179 = vpow2.f32 %v1884_v55 }
  0xe5   :  { %2181 = vpow2.f32 %v1885_v56 }
  0xed   :  { %v2176_v57 = vpop.eup %2175 }
  0xee   :  { %v2178_v58 = vpop.eup %2177  ;;  %v724_v59 = vadd.f32 1.0, %v2176_v57  ;;  %v1116_v57 = vld [vmem:[%s2708_s7 + $0x58] sm:$0xff] }
  0xef   :  { %v725_v60 = vadd.f32 1.0, %v2178_v58 }
  0xf0   :  { %2183 = vrcp.f32 %v724_v59  ;;  %v1120_v59 = vld [vmem:[%s2708_s7 + $0x78] sm:$0xff] }
  0xf1   :  { %v2180_v61 = vpop.eup %2179  ;;  %2185 = vrcp.f32 %v725_v60  ;;  %v1115_v60 = vld [vmem:[%s2708_s7 + $0x50] sm:$0xff] }
  0xf2   :  { %v2182_v62 = vpop.eup %2181  ;;  %v726_v63 = vadd.f32 1.0, %v2180_v61  ;;  %v1119_v61 = vld [vmem:[%s2708_s7 + $0x70] sm:$0xff] }
  0xf3   :  { %v727_v1 = vadd.f32 1.0, %v2182_v62  ;;  %v1114_v62 = vld [vmem:[%s2708_s7 + $0x48] sm:$0xff] }
  0xf4   :  { %2187 = vrcp.f32 %v726_v63  ;;  %v1118_v63 = vld [vmem:[%s2708_s7 + $0x68] sm:$0xff] }
  0xf5   :  { %2189 = vrcp.f32 %v727_v1  ;;  %v1113_v1 = vld [vmem:[%s2708_s7 + $0x40] sm:$0xff] }
  0xfd   :  { %v2184_v2 = vpop.eup %2183 }
  0xfe   :  { %v2186_v3 = vpop.eup %2185  ;;  %v736_v4 = vmul.f32 %v2184_v2, %v708_v41  ;;  %v1117_v2 = vld [vmem:[%s2708_s7 + $0x60] sm:$0xff] }
  0xff   :  { %v737_v6 = vmul.f32 %v2186_v3, %v709_v42 }
 0x100   :  { %2047 = vmatmul.mubr.msk.f32.vlgmr.msra.gmra.mxu0 %vm784_vm5, %v736_v4 }
 0x101   :  { %2058 = vmatmul.mubr.msk.f32.vlgmr.msra.gmra.mxu1 %vm784_vm5, %v737_v6  ;;  %2061 = vmatpush3.msra.mxu0 %v751_v5  ;;  %v2188_v12 = vpop.eup %2187 }
 0x102   :  { %2072 = vmatpush3.msra.mxu1 %v755_v7  ;;  %2062 = vmatprep.subr.mxu0 %v2272_v0  ;;  %v2190_v14 = vpop.eup %2189  ;;  %v738_v16 = vmul.f32 %v2188_v12, %v710_v53  ;;  %v1472_v7 = vld [vmem:[%s2710_s9 + $0x18] sm:$0xff]  ;;  %v1474_v12 = vld [vmem:[%s2710_s9 + $0x28] sm:$0xff] }
 0x103   :  { %2073 = vmatprep.subr.mxu1 %v2272_v0  ;;  %2063 = vmatpush3.msra.mxu0 %v750_v8  ;;  %v739_v17 = vmul.f32 %v2190_v14, %v711_v54  ;;  %v1476_v8 = vld [vmem:[%s2710_s9 + $0x38] sm:$0xff]  ;;  %v1473_v14 = vld [vmem:[%s2710_s9 + $0x20] sm:$0xff] }
 0x104   :  { %2074 = vmatpush3.msra.mxu1 %v754_v9  ;;  %2064 = vmatprep.subr.mxu0 %v2272_v0  ;;  %v1471_v9 = vld [vmem:[%s2710_s9 + $0x10] sm:$0xff] }
 0x105   :  { %2075 = vmatprep.subr.mxu1 %v2272_v0  ;;  %2065 = vmatpush3.msra.mxu0 %v749_v10  ;;  %v1475_v10 = vld [vmem:[%s2710_s9 + $0x30] sm:$0xff] }
 0x106   :  { %2076 = vmatpush3.msra.mxu1 %v753_v11  ;;  %2066 = vmatprep.subr.mxu0 %v2272_v0  ;;  %v1470_v11 = vld [vmem:[%s2710_s9 + $0x8] sm:$0xff] }
 0x107   :  { %2077 = vmatprep.subr.mxu1 %v2272_v0  ;;  %2067 = vmatpush3.msra.mxu0 %v748_v13  ;;  %v1469_v13 = vld [vmem:[%s2710_s9] sm:$0xff] }
 0x108   :  { %2068 = vmatprep.mubr.msk.f32.mxu0 %vm2273_vm0, %v2272_v0  ;;  %2078 = vmatpush3.msra.mxu1 %v752_v15  ;;  %v1898_v15 = vld [vmem:[%s2709_s8] ss:$0 sm:$0xff] }
 0x109   :  { %2079 = vmatprep.mubr.msk.f32.mxu1 %vm2273_vm0, %v2272_v0  ;;  %2069 = vmatmul.mubr.msk.f32.vlgmr.msra.gmra.mxu0 %vm784_vm5, %v738_v16  ;;  %v1899_v16 = vld [vmem:[%s2709_s8 + $0x1] ss:$0 sm:$0xff] }
 0x10a   :  { %2080 = vmatmul.mubr.msk.f32.vlgmr.msra.gmra.mxu1 %vm784_vm5, %v739_v17  ;;  %2082 = vmatprep.subr.mxu0 %v2272_v0 }
 0x10b   :  { %2093 = vmatprep.subr.mxu1 %v2272_v0  ;;  %2090 = vmatprep.mubr.msk.f32.mxu0 %vm2273_vm0, %v2272_v0 }
 0x10c   :  { %2101 = vmatprep.mubr.msk.f32.mxu1 %vm2273_vm0, %v2272_v0  ;;  %2083 = vmatpush3.msra.mxu0 %v1108_v18 }
 0x10d   :  { %2094 = vmatpush3.msra.mxu1 %v1112_v19  ;;  %2084 = vmatprep.subr.mxu0 %v2272_v0 }
 0x10e   :  { %2095 = vmatprep.subr.mxu1 %v2272_v0  ;;  %2085 = vmatpush3.msra.mxu0 %v1107_v20 }
 0x10f   :  { %2096 = vmatpush3.msra.mxu1 %v1111_v21  ;;  %2086 = vmatprep.subr.mxu0 %v2272_v0 }
 0x110   :  { %2097 = vmatprep.subr.mxu1 %v2272_v0  ;;  %2087 = vmatpush3.msra.mxu0 %v1106_v22 }
 0x111   :  { %2098 = vmatpush3.msra.mxu1 %v1110_v23  ;;  %2088 = vmatprep.subr.mxu0 %v2272_v0 }
 0x112   :  { %2099 = vmatprep.subr.mxu1 %v2272_v0  ;;  %2089 = vmatpush3.msra.mxu0 %v1105_v24 }
 0x113   :  { %2100 = vmatpush3.msra.mxu1 %v1109_v25  ;;  %2104 = vmatprep.subr.mxu0 %v2272_v0  ;;  %v1900_v25 = vld [vmem:[%s2709_s8 + $0x2] ss:$0 sm:$0xff] }
 0x114   :  { %2115 = vmatprep.subr.mxu1 %v2272_v0 }
 0x1c0   :  { %v854_v28 = vpop.f32.mrf.mxu0 }
 0x1c1   :  { %v855_v29 = vadd.f32 %v1886_v26, %v854_v28  ;;  %v927_v30 = vpop.f32.mrf.mxu1  ;;  %v1901_v26 = vld [vmem:[%s2709_s8 + $0x3] ss:$0 sm:$0xff] }
 0x1c2   :  { %v928_v31 = vadd.f32 %v1887_v27, %v927_v30  ;;  %v2048_v32 = vpop.f32.mrf.mxu0 }
 0x1c3   :  { %v1894_v33 = vmul.f32 -1.442695, %v855_v29  ;;  %v2059_v34 = vpop.f32.mrf.mxu1 }
 0x1c4   :  { %v1895_v35 = vmul.f32 -1.442695, %v928_v31 }
 0x1c5   :  { %2191 = vpow2.f32 %v1894_v33 }
 0x1c6   :  { %2193 = vpow2.f32 %v1895_v35 }
 0x1c9   :  { %v1000_v38 = vpop.f32.mrf.mxu0 }
 0x1ca   :  { %v1001_v39 = vadd.f32 %v1888_v36, %v1000_v38  ;;  %v1073_v40 = vpop.f32.mrf.mxu1 }
 0x1cb   :  { %v1074_v41 = vadd.f32 %v1889_v37, %v1073_v40  ;;  %v2070_v42 = vpop.f32.mrf.mxu0 }
 0x1cc   :  { %v1896_v43 = vmul.f32 -1.442695, %v1001_v39  ;;  %v2081_v44 = vpop.f32.mrf.mxu1 }
 0x1cd   :  { %v1897_v45 = vmul.f32 -1.442695, %v1074_v41 }
 0x1ce   :  { %2195 = vpow2.f32 %v1896_v43 }
 0x1cf   :  { %2197 = vpow2.f32 %v1897_v45 }
 0x1d2   :  { %v2192_v46 = vpop.eup %2191 }
 0x1d3   :  { %v2194_v47 = vpop.eup %2193  ;;  %v1089_v48 = vadd.f32 1.0, %v2192_v46  ;;  %v1480_v46 = vld [vmem:[%s2710_s9 + $0x58] sm:$0xff] }
 0x1d4   :  { %v1090_v49 = vadd.f32 1.0, %v2194_v47 }
 0x1d5   :  { %2199 = vrcp.f32 %v1089_v48  ;;  %v1484_v48 = vld [vmem:[%s2710_s9 + $0x78] sm:$0xff] }
 0x1d6   :  { %2201 = vrcp.f32 %v1090_v49  ;;  %v1479_v49 = vld [vmem:[%s2710_s9 + $0x50] sm:$0xff] }
 0x1db   :  { %v2196_v50 = vpop.eup %2195 }
 0x1dc   :  { %v2198_v51 = vpop.eup %2197  ;;  %v1091_v52 = vadd.f32 1.0, %v2196_v50  ;;  %v1483_v50 = vld [vmem:[%s2710_s9 + $0x70] sm:$0xff] }
 0x1dd   :  { %v1092_v53 = vadd.f32 1.0, %v2198_v51  ;;  %v1478_v51 = vld [vmem:[%s2710_s9 + $0x48] sm:$0xff] }
 0x1de   :  { %2203 = vrcp.f32 %v1091_v52  ;;  %v1482_v52 = vld [vmem:[%s2710_s9 + $0x68] sm:$0xff] }
 0x1df   :  { %2205 = vrcp.f32 %v1092_v53  ;;  %v1477_v53 = vld [vmem:[%s2710_s9 + $0x40] sm:$0xff] }
 0x1e2   :  { %v2200_v54 = vpop.eup %2199 }
 0x1e3   :  { %v2202_v55 = vpop.eup %2201  ;;  %v1101_v56 = vmul.f32 %v2200_v54, %v855_v29  ;;  %v1481_v54 = vld [vmem:[%s2710_s9 + $0x60] sm:$0xff] }
 0x1e4   :  { %v1102_v58 = vmul.f32 %v2202_v55, %v928_v31 }
 0x1e5   :  { %2091 = vmatmul.mubr.msk.f32.vlgmr.msra.gmra.mxu0 %vm784_vm5, %v1101_v56 }
 0x1e6   :  { %2102 = vmatmul.mubr.msk.f32.vlgmr.msra.gmra.mxu1 %vm784_vm5, %v1102_v58  ;;  %2105 = vmatpush3.msra.mxu0 %v1116_v57 }
 0x1e7   :  { %2116 = vmatpush3.msra.mxu1 %v1120_v59  ;;  %2106 = vmatprep.subr.mxu0 %v2272_v0  ;;  %v1910_v59 = vld [vmem:[%s2711_s10] ss:$0 sm:$0xff] }
 0x1e8   :  { %2117 = vmatprep.subr.mxu1 %v2272_v0  ;;  %2107 = vmatpush3.msra.mxu0 %v1115_v60  ;;  %v1911_v60 = vld [vmem:[%s2711_s10 + $0x1] ss:$0 sm:$0xff] }
 0x1e9   :  { %2118 = vmatpush3.msra.mxu1 %v1119_v61  ;;  %2108 = vmatprep.subr.mxu0 %v2272_v0 }
 0x1ea   :  { %2119 = vmatprep.subr.mxu1 %v2272_v0  ;;  %2109 = vmatpush3.msra.mxu0 %v1114_v62 }
 0x1eb   :  { %v2204_v3 = vpop.eup %2203  ;;  %2120 = vmatpush3.msra.mxu1 %v1118_v63  ;;  %2110 = vmatprep.subr.mxu0 %v2272_v0 }
 0x1ec   :  { %v2206_v4 = vpop.eup %2205  ;;  %v1103_v5 = vmul.f32 %v2204_v3, %v1001_v39  ;;  %2121 = vmatprep.subr.mxu1 %v2272_v0  ;;  %2111 = vmatpush3.msra.mxu0 %v1113_v1 }
 0x1ed   :  { %v1104_v6 = vmul.f32 %v2206_v4, %v1074_v41  ;;  %2112 = vmatprep.mubr.msk.f32.mxu0 %vm2273_vm0, %v2272_v0  ;;  %2122 = vmatpush3.msra.mxu1 %v1117_v2 }
 0x1ee   :  { %2123 = vmatprep.mubr.msk.f32.mxu1 %vm2273_vm0, %v2272_v0  ;;  %2113 = vmatmul.mubr.msk.f32.vlgmr.msra.gmra.mxu0 %vm784_vm5, %v1103_v5  ;;  %v1912_v5 = vld [vmem:[%s2711_s10 + $0x2] ss:$0 sm:$0xff] }
 0x1ef   :  { %2124 = vmatmul.mubr.msk.f32.vlgmr.msra.gmra.mxu1 %vm784_vm5, %v1104_v6  ;;  %2126 = vmatprep.subr.mxu0 %v2272_v0  ;;  %v1913_v6 = vld [vmem:[%s2711_s10 + $0x3] ss:$0 sm:$0xff] }
 0x1f0   :  { %2137 = vmatprep.subr.mxu1 %v2272_v0  ;;  %2134 = vmatprep.mubr.msk.f32.mxu0 %vm2273_vm0, %v2272_v0 }
 0x1f1   :  { %2145 = vmatprep.mubr.msk.f32.mxu1 %vm2273_vm0, %v2272_v0  ;;  %2127 = vmatpush3.msra.mxu0 %v1472_v7 }
 0x1f2   :  { %2138 = vmatpush3.msra.mxu1 %v1476_v8  ;;  %2128 = vmatprep.subr.mxu0 %v2272_v0 }
 0x1f3   :  { %2139 = vmatprep.subr.mxu1 %v2272_v0  ;;  %2129 = vmatpush3.msra.mxu0 %v1471_v9 }
 0x1f4   :  { %2140 = vmatpush3.msra.mxu1 %v1475_v10  ;;  %2130 = vmatprep.subr.mxu0 %v2272_v0 }
 0x1f5   :  { %2141 = vmatprep.subr.mxu1 %v2272_v0  ;;  %2131 = vmatpush3.msra.mxu0 %v1470_v11 }
 0x1f6   :  { %2142 = vmatpush3.msra.mxu1 %v1474_v12  ;;  %2132 = vmatprep.subr.mxu0 %v2272_v0 }
 0x1f7   :  { %2143 = vmatprep.subr.mxu1 %v2272_v0  ;;  %2133 = vmatpush3.msra.mxu0 %v1469_v13 }
 0x1f8   :  { %2144 = vmatpush3.msra.mxu1 %v1473_v14  ;;  %2148 = vmatprep.subr.mxu0 %v2272_v0 }
 0x1f9   :  { %2159 = vmatprep.subr.mxu1 %v2272_v0 }
 0x2a5   :  { %v1218_v17 = vpop.f32.mrf.mxu0 }
 0x2a6   :  { %v1219_v18 = vadd.f32 %v1898_v15, %v1218_v17  ;;  %v1291_v19 = vpop.f32.mrf.mxu1 }
 0x2a7   :  { %v1292_v20 = vadd.f32 %v1899_v16, %v1291_v19  ;;  %v2092_v21 = vpop.f32.mrf.mxu0 }
 0x2a8   :  { %v1906_v22 = vmul.f32 -1.442695, %v1219_v18  ;;  %v2103_v23 = vpop.f32.mrf.mxu1 }
 0x2a9   :  { %v1907_v24 = vmul.f32 -1.442695, %v1292_v20 }
 0x2aa   :  { %2207 = vpow2.f32 %v1906_v22 }
 0x2ab   :  { %2209 = vpow2.f32 %v1907_v24 }
 0x2ae   :  { %v1364_v27 = vpop.f32.mrf.mxu0 }
 0x2af   :  { %v1365_v28 = vadd.f32 %v1900_v25, %v1364_v27  ;;  %v1437_v29 = vpop.f32.mrf.mxu1 }
 0x2b0   :  { %v1438_v30 = vadd.f32 %v1901_v26, %v1437_v29  ;;  %v2114_v31 = vpop.f32.mrf.mxu0 }
 0x2b1   :  { %v1908_v32 = vmul.f32 -1.442695, %v1365_v28  ;;  %v2125_v33 = vpop.f32.mrf.mxu1 }
 0x2b2   :  { %v1909_v34 = vmul.f32 -1.442695, %v1438_v30  ;;  %v1845_v33 = vlaneseq }
 0x2b3   :  { %2211 = vpow2.f32 %v1908_v32 }
 0x2b4   :  { %2213 = vpow2.f32 %v1909_v34 }
 0x2b7   :  { %v2208_v35 = vpop.eup %2207 }
 0x2b8   :  { %v2210_v36 = vpop.eup %2209  ;;  %v1453_v37 = vadd.f32 1.0, %v2208_v35 }
 0x2b9   :  { %v1454_v38 = vadd.f32 1.0, %v2210_v36 }
 0x2ba   :  { %2215 = vrcp.f32 %v1453_v37 }
 0x2bb   :  { %2217 = vrcp.f32 %v1454_v38  ;;  %v1846_v38 = vand.u32 127, %v1845_v33 }
 0x2bd   :  { %vm1847_vm6 = vcmp.lt.s32.totalorder %v1846_v38, 6 }
 0x2c0   :  { %v2212_v39 = vpop.eup %2211 }
 0x2c1   :  { %v2214_v40 = vpop.eup %2213  ;;  %v1455_v41 = vadd.f32 1.0, %v2212_v39 }
 0x2c2   :  { %v1456_v42 = vadd.f32 1.0, %v2214_v40 }
 0x2c3   :  { %2219 = vrcp.f32 %v1455_v41 }
 0x2c4   :  { %2221 = vrcp.f32 %v1456_v42 }
 0x2c7   :  { %v2216_v43 = vpop.eup %2215 }
 0x2c8   :  { %v2218_v44 = vpop.eup %2217  ;;  %v1465_v45 = vmul.f32 %v2216_v43, %v1219_v18 }
 0x2c9   :  { %v1466_v47 = vmul.f32 %v2218_v44, %v1292_v20 }
 0x2ca   :  { %2135 = vmatmul.mubr.msk.f32.vlgmr.msra.gmra.mxu0 %vm784_vm5, %v1465_v45 }
 0x2cb   :  { %2146 = vmatmul.mubr.msk.f32.vlgmr.msra.gmra.mxu1 %vm784_vm5, %v1466_v47  ;;  %2149 = vmatpush3.msra.mxu0 %v1480_v46 }
 0x2cc   :  { %2160 = vmatpush3.msra.mxu1 %v1484_v48  ;;  %2150 = vmatprep.subr.mxu0 %v2272_v0 }
 0x2cd   :  { %2161 = vmatprep.subr.mxu1 %v2272_v0  ;;  %2151 = vmatpush3.msra.mxu0 %v1479_v49 }
 0x2ce   :  { %2162 = vmatpush3.msra.mxu1 %v1483_v50  ;;  %2152 = vmatprep.subr.mxu0 %v2272_v0 }
 0x2cf   :  { %2163 = vmatprep.subr.mxu1 %v2272_v0  ;;  %2153 = vmatpush3.msra.mxu0 %v1478_v51 }
 0x2d0   :  { %v2220_v55 = vpop.eup %2219  ;;  %2164 = vmatpush3.msra.mxu1 %v1482_v52  ;;  %2154 = vmatprep.subr.mxu0 %v2272_v0 }
 0x2d1   :  { %v2222_v56 = vpop.eup %2221  ;;  %v1467_v57 = vmul.f32 %v2220_v55, %v1365_v28  ;;  %2165 = vmatprep.subr.mxu1 %v2272_v0  ;;  %2155 = vmatpush3.msra.mxu0 %v1477_v53 }
 0x2d2   :  { %v1468_v58 = vmul.f32 %v2222_v56, %v1438_v30  ;;  %2156 = vmatprep.mubr.msk.f32.mxu0 %vm2273_vm0, %v2272_v0  ;;  %2166 = vmatpush3.msra.mxu1 %v1481_v54 }
 0x2d3   :  { %2167 = vmatprep.mubr.msk.f32.mxu1 %vm2273_vm0, %v2272_v0  ;;  %2157 = vmatmul.mubr.msk.f32.vlgmr.msra.gmra.mxu0 %vm784_vm5, %v1467_v57 }
 0x2d4   :  { %2168 = vmatmul.mubr.msk.f32.vlgmr.msra.gmra.mxu1 %vm784_vm5, %v1468_v58 }
 0x38a   :  { %v1582_v61 = vpop.f32.mrf.mxu0 }
 0x38b   :  { %v1583_v62 = vadd.f32 %v1910_v59, %v1582_v61  ;;  %v1655_v63 = vpop.f32.mrf.mxu1 }
 0x38c   :  { %v1656_v1 = vadd.f32 %v1911_v60, %v1655_v63  ;;  %v2136_v2 = vpop.f32.mrf.mxu0 }
 0x38d   :  { %v1918_v3 = vmul.f32 -1.442695, %v1583_v62  ;;  %v2147_v4 = vpop.f32.mrf.mxu1 }
 0x38e   :  { %v1919_v0 = vmul.f32 -1.442695, %v1656_v1 }
 0x38f   :  { %2223 = vpow2.f32 %v1918_v3 }
 0x390   :  { %2225 = vpow2.f32 %v1919_v0 }
 0x393   :  { %v1728_v7 = vpop.f32.mrf.mxu0 }
 0x394   :  { %v1729_v8 = vadd.f32 %v1912_v5, %v1728_v7  ;;  %v1801_v9 = vpop.f32.mrf.mxu1 }
 0x395   :  { %v1802_v10 = vadd.f32 %v1913_v6, %v1801_v9  ;;  %v2158_v11 = vpop.f32.mrf.mxu0 }
 0x396   :  { %v1920_v12 = vmul.f32 -1.442695, %v1729_v8  ;;  %v2169_v13 = vpop.f32.mrf.mxu1 }
 0x397   :  { %v1921_v14 = vmul.f32 -1.442695, %v1802_v10 }
 0x398   :  { %2227 = vpow2.f32 %v1920_v12 }
 0x399   :  { %2229 = vpow2.f32 %v1921_v14 }
 0x39c   :  { %v2224_v15 = vpop.eup %2223 }
 0x39d   :  { %v2226_v16 = vpop.eup %2225  ;;  %v1817_v17 = vadd.f32 1.0, %v2224_v15 }
 0x39e   :  { %v1818_v18 = vadd.f32 1.0, %v2226_v16 }
 0x39f   :  { %2231 = vrcp.f32 %v1817_v17 }
 0x3a0   :  { %2233 = vrcp.f32 %v1818_v18 }
 0x3a5   :  { %v2228_v19 = vpop.eup %2227 }
 0x3a6   :  { %v2230_v20 = vpop.eup %2229  ;;  %v1819_v21 = vadd.f32 1.0, %v2228_v19 }
 0x3a7   :  { %v1820_v22 = vadd.f32 1.0, %v2230_v20 }
 0x3a8   :  { %2235 = vrcp.f32 %v1819_v21 }
 0x3a9   :  { %2237 = vrcp.f32 %v1820_v22 }
 0x3ac   :  { %v2232_v23 = vpop.eup %2231 }
 0x3ad   :  { %v2234_v24 = vpop.eup %2233  ;;  %v1829_v25 = vmul.f32 4.0, %v2232_v23 }
 0x3ae   :  { %v1830_v26 = vmul.f32 4.0, %v2234_v24 }
 0x3af   :  { %v1833_v27 = vadd.f32 -5.0, %v1829_v25 }
 0x3b0   :  { %v1834_v28 = vadd.f32 -5.0, %v1830_v26 }
 0x3b1   :  { %v1837_v29 = vmul.f32 1.442695, %v1833_v27 }
 0x3b2   :  { %v1839_v30 = vmul.f32 1.442695, %v1834_v28 }
 0x3b3   :  { %2239 = vpow2.f32 %v1837_v29 }
 0x3b4   :  { %2241 = vpow2.f32 %v1839_v30 }
 0x3b5   :  { %v2236_v31 = vpop.eup %2235 }
 0x3b6   :  { %v2238_v32 = vpop.eup %2237  ;;  %v1831_v34 = vmul.f32 4.0, %v2236_v31 }
 0x3b7   :  { %v1832_v35 = vmul.f32 4.0, %v2238_v32 }
 0x3b8   :  { %v1835_v36 = vadd.f32 -5.0, %v1831_v34 }
 0x3b9   :  { %v1836_v37 = vadd.f32 -5.0, %v1832_v35 }
 0x3ba   :  { %v1841_v39 = vmul.f32 1.442695, %v1835_v36 }
 0x3bb   :  { %v1843_v40 = vmul.f32 1.442695, %v1836_v37 }
 0x3bc   :  { %2243 = vpow2.f32 %v1841_v39 }
 0x3bd   :  { %2245 = vpow2.f32 %v1843_v40 }
 0x3c0   :  { %v2240_v41 = vpop.eup %2239 }
 0x3c1   :  { %v2242_v42 = vpop.eup %2241  ;;  %v1848_v43 = vsel %vm1847_vm6, %v1583_v62, %v2240_v41 }
 0x3c2   :  { %1853 = vst.msk [vmem:[%s2712_s11] sm:$0xff] %vm1852_vm7, %v1848_v43  ;;  %v1849_v44 = vsel %vm1847_vm6, %v1656_v1, %v2242_v42 }
 0x3c3   :  { %1854 = vst.msk [vmem:[%s2712_s11 + $0x8] sm:$0xff] %vm1852_vm7, %v1849_v44 }
 0x3c9   :  { %v2244_v45 = vpop.eup %2243 }
 0x3ca   :  { %v2246_v46 = vpop.eup %2245  ;;  %v1850_v47 = vsel %vm1847_vm6, %v1729_v8, %v2244_v45 }
 0x3cb   :  { %1855 = vst.msk [vmem:[%s2712_s11 + $0x10] sm:$0xff] %vm1852_vm7, %v1850_v47  ;;  %v1851_v48 = vsel %vm1847_vm6, %v1802_v10, %v2246_v46 }
 0x3cc   :  { %1856 = vst.msk [vmem:[%s2712_s11 + $0x18] sm:$0xff] %vm1852_vm7, %v1851_v48 }
 0x3cd   :  { %1861 = vsyncpa [#allocation3], 1 }

</bundles_post_ra>
